<compile_context>
chip_gen: v7x
topology: tpu7x:2x2x1
jax: 0.10.0
libtpu: 0.0.40
codegen_flags: <defaults>
</compile_context>

<pallas_src>
import functools

import jax
import jax.numpy as jnp
from jax.experimental import pallas as pl
from jax.experimental.pallas import tpu as pltpu


def _pow_static(base, gamma):
    """base**gamma for static Python gamma, base >= 0.

    Small non-negative integer exponents -> VPU multiply chain (co-issues for
    free); otherwise exp(gamma*log(base)) with a guard so base==0 gives 0."""
    g = float(gamma)
    if g == int(g) and 0 <= int(g) <= 8:
        gi = int(g)
        if gi == 0:
            return jnp.ones_like(base)
        out = base
        for _ in range(gi - 1):
            out = out * base
        return out
    safe = jnp.maximum(base, jnp.finfo(jnp.float32).tiny)
    p = jnp.exp(jnp.float32(g) * jnp.log(safe))
    return jnp.where(base > 0.0, p, 0.0)


def _focal_loss_kernel(x_ref, t_ref, out_ref, *, gamma, ignore_index, n_rows):
    # x_ref  : (TILE_N, C)   logits (native dtype) in VMEM
    # t_ref  : (TILE_N, 1)   int32 targets in VMEM
    # out_ref: (1, 8, 128)   f32 partials; [0,0,0]=sum(loss), [0,0,1]=n_valid
    tile_n = x_ref.shape[0]
    x = x_ref[...].astype(jnp.float32)                     # upcast in-register
    t = t_ref[...]                                         # (TILE_N, 1)

    # Row validity: in-bounds (ragged tail handled here, no host-side pad of x)
    # and not ignore_index.  NOTE: out-of-range targets (t >= C, t != ignore)
    # silently contribute z_t = 0 instead of erroring like PyTorch nll_loss.
    row = (pl.program_id(0) * tile_n
           + jax.lax.broadcasted_iota(jnp.int32, (tile_n, 1), 0))
    valid = (row < n_rows) & (t != ignore_index)           # (TILE_N, 1) bool

    # Numerically-stable log-softmax pieces — single full-tile exp.
    m = jnp.max(x, axis=1, keepdims=True)                  # (TILE_N, 1)
    z = x - m
    sum_ez = jnp.sum(jnp.exp(z), axis=1, keepdims=True)    # (TILE_N, 1)
    lse = jnp.log(sum_ez)                                  # (TILE_N, 1)

    # Gather z at the target class via select + reduce (no float one-hot).
    col = jax.lax.broadcasted_iota(jnp.int32, x.shape, 1)  # (TILE_N, C)
    z_t = jnp.sum(jnp.where(col == t, z, 0.0), axis=1, keepdims=True)

    log_pt_t = z_t - lse                                   # (TILE_N, 1)
    pt_t = jnp.exp(log_pt_t)                               # per-row exp only
    one_minus = jnp.maximum(1.0 - pt_t, 0.0)               # guard fp slop
    mod = _pow_static(one_minus, gamma) * log_pt_t         # (TILE_N, 1)

    # jnp.where (not multiply) so NaN/Inf from garbage tail rows cannot leak.
    loss_sum = jnp.sum(jnp.where(valid, -mod, 0.0))        # scalar
    n_valid = jnp.sum(valid.astype(jnp.float32))           # scalar

    lane = jax.lax.broadcasted_iota(jnp.int32, out_ref.shape, 2)
    out_ref[...] = jnp.where(lane == 0, loss_sum,
                             jnp.where(lane == 1, n_valid, 0.0))


def _round_up(v, m):
    return (v + m - 1) // m * m


def _cdiv(a, b):
    return -(-a // b)


def focal_loss(x, target, gamma=2.0, ignore_index=-100):
    """x: [N, C] float (any dtype), target: [N] int. Scalar mean focal loss."""
    n, c = x.shape
    itemsize = jnp.dtype(x.dtype).itemsize
    t2 = target.reshape(n, 1).astype(jnp.int32)

    # Sublane multiple for the logits dtype: 8 (f32) / 16 (bf16) / 32 (int8/fp8).
    sub = 8 * max(1, 4 // itemsize)

    # Per-generation byte budgets.  v5e/v6e have 128 MiB VMEM per TensorCore;
    # v7x has 64 MiB, so default to the conservative (v7x-safe) numbers unless
    # a 128-MiB chip is detected.
    try:
        kind = jax.devices()[0].device_kind.lower()
    except Exception:  # pragma: no cover - defensive, stay conservative
        kind = ""
    big_vmem = ("v5" in kind) or ("v6" in kind)
    x_tile_bytes = (8 if big_vmem else 4) * 1024 * 1024   # DMA tile for logits
    vmem_budget = (48 if big_vmem else 26) * 1024 * 1024  # total working set
    vmem_limit = (64 if big_vmem else 48) * 1024 * 1024   # scoped VMEM limit

    # VMEM accounting per row:
    #   2x double-buffered x block          : 2 * C * itemsize
    #   2x lane-padded (row,128)-word target: 2 * 512 bytes
    #   in-kernel f32 temporaries (x_f32, z, exp(z) reuse) ~ 3 * C * 4
    bytes_row_x = c * itemsize
    bytes_row_all = 2 * bytes_row_x + 2 * 128 * 4 + 3 * c * 4
    rows_x = max(sub, x_tile_bytes // max(bytes_row_x, 1))
    rows_vm = max(sub, vmem_budget // max(bytes_row_all, 1))
    tile_n = max(sub, (min(rows_x, rows_vm) // sub) * sub)
    # Keep >= ~4 grid blocks (when N allows) so the parallel axis can shard
    # across v7x's two TensorCores instead of collapsing to one block.
    tile_n = min(tile_n, max(sub, _round_up(_cdiv(n, 4), sub)))

    num_blocks = _cdiv(n, tile_n)

    kernel = functools.partial(_focal_loss_kernel, gamma=float(gamma),
                               ignore_index=int(ignore_index), n_rows=int(n))
    partials = pl.pallas_call(
        kernel,
        out_shape=jax.ShapeDtypeStruct((num_blocks, 8, 128), jnp.float32),
        grid=(num_blocks,),
        in_specs=[
            pl.BlockSpec((tile_n, c), lambda i: (i, 0)),
            pl.BlockSpec((tile_n, 1), lambda i: (i, 0)),
        ],
        out_specs=pl.BlockSpec((1, 8, 128), lambda i: (i, 0, 0)),
        compiler_params=pltpu.CompilerParams(
            dimension_semantics=("parallel",),
            vmem_limit_bytes=vmem_limit,
        ),
        cost_estimate=pl.CostEstimate(
            flops=6 * n * c,
            transcendentals=n * c + 2 * n,
            bytes_accessed=n * c * itemsize + n * 4
            + num_blocks * 8 * 128 * 4,
        ),
    )(x, t2)

    loss_sum = jnp.sum(partials[:, 0, 0])
    n_valid = jnp.sum(partials[:, 0, 1])
    # Matches PyTorch mean reduction: 0/0 -> NaN when every row is ignored.
    return loss_sum / n_valid


def _focal_loss_reference(x, target, gamma=2.0, ignore_index=-100):
    log_pt = jax.nn.log_softmax(x.astype(jnp.float32), axis=1)
    pt = jnp.exp(log_pt)
    mod = jnp.power(1.0 - pt, gamma) * log_pt
    picked = jnp.take_along_axis(
        mod, jnp.clip(target, 0, x.shape[1] - 1)[:, None], axis=1)[:, 0]
    valid = (target != ignore_index).astype(jnp.float32)
    return jnp.sum(-picked * valid) / jnp.sum(valid)


if __name__ == "__main__":
    key = jax.random.PRNGKey(0)
    kx, kt, kx2, kt2 = jax.random.split(key, 4)

    # Case 1: module-typical [N, C] logits, gamma=2, one ignored row.
    N, C = 16, 32
    x = jax.random.normal(kx, (N, C), dtype=jnp.float32)
    target = jax.random.randint(kt, (N,), 0, C, dtype=jnp.int32)
    target = target.at[3].set(-100)
    loss = focal_loss(x, target, gamma=2.0, ignore_index=-100)
    jax.block_until_ready(loss)
    ref = _focal_loss_reference(x, target, gamma=2.0, ignore_index=-100)
    assert jnp.allclose(loss, ref, atol=1e-5, rtol=1e-5), (loss, ref)

    # Case 2: N not a multiple of the tile (exercises in-kernel ragged-tail
    # masking, no host-side padding) + non-integer gamma.
    N2, C2 = 13, 40
    x2 = jax.random.normal(kx2, (N2, C2), dtype=jnp.float32)
    target2 = jax.random.randint(kt2, (N2,), 0, C2, dtype=jnp.int32)
    loss2 = focal_loss(x2, target2, gamma=1.5, ignore_index=-100)
    jax.block_until_ready(loss2)
    ref2 = _focal_loss_reference(x2, target2, gamma=1.5, ignore_index=-100)
    assert jnp.allclose(loss2, ref2, atol=1e-5, rtol=1e-5), (loss2, ref2)

    print("KERNEL_OK")
</pallas_src>

<mosaic_0001>
module attributes {stable_mosaic.version = 11 : i64} {
  func.func @_focal_loss_kernel(%arg0: i32, %arg1: memref<8x32xf32, #tpu.memory_space<vmem>>, %arg2: memref<8x1xi32, #tpu.memory_space<vmem>>, %arg3: memref<1x8x128xf32, #tpu.memory_space<vmem>>) attributes {dimension_semantics = [#tpu.dimension_semantics<parallel>], iteration_bounds = array<i64: 2>, scalar_prefetch = 0 : i64, scratch_operands = 0 : i64, tpu.core_type = #tpu.core_type<tc>, window_params = [{transform_indices = @transform_0, window_bounds = array<i64: 8, 32>}, {transform_indices = @transform_1, window_bounds = array<i64: 8, 1>}, {transform_indices = @transform_2, window_bounds = array<i64: 1, 8, 128>}]} {
    %c0 = arith.constant 0 : index
    %c0_0 = arith.constant 0 : index
    %0 = vector.load %arg1[%c0, %c0_0] : memref<8x32xf32, #tpu.memory_space<vmem>>, vector<8x32xf32>
    %c0_1 = arith.constant 0 : index
    %c0_2 = arith.constant 0 : index
    %1 = vector.load %arg2[%c0_1, %c0_2] : memref<8x1xi32, #tpu.memory_space<vmem>>, vector<8x1xi32>
    %c8_i32 = arith.constant 8 : i32
    %2 = arith.muli %arg0, %c8_i32 : i32
    %3 = tpu.iota {dimensions = array<i32: 0>} : vector<8x1xi32>
    %4 = vector.broadcast %2 : i32 to vector<8x1xi32>
    %5 = arith.addi %4, %3 : vector<8x1xi32>
    %c16_i32 = arith.constant 16 : i32
    %6 = vector.broadcast %c16_i32 : i32 to vector<8x1xi32>
    %7 = arith.cmpi slt, %5, %6 : vector<8x1xi32>
    %c-100_i32 = arith.constant -100 : i32
    %8 = vector.broadcast %c-100_i32 : i32 to vector<8x1xi32>
    %9 = arith.cmpi ne, %1, %8 : vector<8x1xi32>
    %10 = arith.andi %7, %9 : vector<8x1xi1>
    %cst = arith.constant dense<0xFF800000> : vector<8xf32>
    %11 = vector.multi_reduction <maximumf>, %0, %cst [1] : vector<8x32xf32> to vector<8xf32>
    %12 = vector.shape_cast %11 : vector<8xf32> to vector<8x1xf32>
    %13 = vector.broadcast %12 : vector<8x1xf32> to vector<8x32xf32>
    %14 = arith.subf %0, %13 : vector<8x32xf32>
    %15 = math.exp %14 : vector<8x32xf32>
    %cst_3 = arith.constant dense<0.000000e+00> : vector<8xf32>
    %16 = vector.multi_reduction <add>, %15, %cst_3 [1] : vector<8x32xf32> to vector<8xf32>
    %17 = vector.shape_cast %16 : vector<8xf32> to vector<8x1xf32>
    %18 = math.log %17 : vector<8x1xf32>
    %19 = tpu.iota {dimensions = array<i32: 1>} : vector<8x32xi32>
    %20 = vector.broadcast %1 : vector<8x1xi32> to vector<8x32xi32>
    %21 = arith.cmpi eq, %19, %20 : vector<8x32xi32>
    %cst_4 = arith.constant 0.000000e+00 : f32
    %22 = vector.broadcast %cst_4 : f32 to vector<8x32xf32>
    %23 = arith.select %21, %14, %22 : vector<8x32xi1>, vector<8x32xf32>
    %cst_5 = arith.constant dense<0.000000e+00> : vector<8xf32>
    %24 = vector.multi_reduction <add>, %23, %cst_5 [1] : vector<8x32xf32> to vector<8xf32>
    %25 = vector.shape_cast %24 : vector<8xf32> to vector<8x1xf32>
    %26 = arith.subf %25, %18 : vector<8x1xf32>
    %27 = math.exp %26 : vector<8x1xf32>
    %cst_6 = arith.constant 1.000000e+00 : f32
    %28 = vector.broadcast %cst_6 : f32 to vector<8x1xf32>
    %29 = arith.subf %28, %27 : vector<8x1xf32>
    %cst_7 = arith.constant 0.000000e+00 : f32
    %30 = vector.broadcast %cst_7 : f32 to vector<8x1xf32>
    %31 = arith.maximumf %29, %30 : vector<8x1xf32>
    %32 = arith.mulf %31, %31 : vector<8x1xf32>
    %33 = arith.mulf %32, %26 : vector<8x1xf32>
    %cst_8 = arith.constant 0.000000e+00 : f32
    %34 = vector.broadcast %cst_8 : f32 to vector<8x1xf32>
    %35 = arith.subf %34, %33 : vector<8x1xf32>
    %cst_9 = arith.constant 0.000000e+00 : f32
    %36 = vector.broadcast %cst_9 : f32 to vector<8x1xf32>
    %37 = arith.select %10, %35, %36 : vector<8x1xi1>, vector<8x1xf32>
    %38 = vector.shape_cast %37 : vector<8x1xf32> to vector<1x8x1xf32>
    %cst_10 = arith.constant dense<0.000000e+00> : vector<1xf32>
    %39 = vector.multi_reduction <add>, %38, %cst_10 [1, 2] : vector<1x8x1xf32> to vector<1xf32>
    %40 = vector.shape_cast %39 : vector<1xf32> to vector<1x1x1xf32>
    %41 = vector.extract %40[0, 0, 0] : f32 from vector<1x1x1xf32>
    %42 = arith.extui %10 : vector<8x1xi1> to vector<8x1xi32>
    %43 = arith.sitofp %42 : vector<8x1xi32> to vector<8x1xf32>
    %44 = vector.shape_cast %43 : vector<8x1xf32> to vector<1x8x1xf32>
    %cst_11 = arith.constant dense<0.000000e+00> : vector<1xf32>
    %45 = vector.multi_reduction <add>, %44, %cst_11 [1, 2] : vector<1x8x1xf32> to vector<1xf32>
    %46 = vector.shape_cast %45 : vector<1xf32> to vector<1x1x1xf32>
    %47 = vector.extract %46[0, 0, 0] : f32 from vector<1x1x1xf32>
    %48 = tpu.iota {dimensions = array<i32: 2>} : vector<1x8x128xi32>
    %c0_i32 = arith.constant 0 : i32
    %49 = vector.broadcast %c0_i32 : i32 to vector<1x8x128xi32>
    %50 = arith.cmpi eq, %48, %49 : vector<1x8x128xi32>
    %c1_i32 = arith.constant 1 : i32
    %51 = vector.broadcast %c1_i32 : i32 to vector<1x8x128xi32>
    %52 = arith.cmpi eq, %48, %51 : vector<1x8x128xi32>
    %cst_12 = arith.constant 0.000000e+00 : f32
    %53 = vector.broadcast %47 : f32 to vector<1x8x128xf32>
    %54 = vector.broadcast %cst_12 : f32 to vector<1x8x128xf32>
    %55 = arith.select %52, %53, %54 : vector<1x8x128xi1>, vector<1x8x128xf32>
    %56 = vector.broadcast %41 : f32 to vector<1x8x128xf32>
    %57 = arith.select %50, %56, %55 : vector<1x8x128xi1>, vector<1x8x128xf32>
    %c0_13 = arith.constant 0 : index
    %c0_14 = arith.constant 0 : index
    %c0_15 = arith.constant 0 : index
    %58 = vector.load %arg3[%c0_13, %c0_14, %c0_15] : memref<1x8x128xf32, #tpu.memory_space<vmem>>, vector<1x8x128xf32>
    tpu.vector_store %arg3[%c0_13, %c0_14, %c0_15], %57 {strides = array<i32>} : memref<1x8x128xf32, #tpu.memory_space<vmem>>, vector<1x8x128xf32>,
    return
  }
  func.func @transform_0(%arg0: i32) -> (i32, i32) {
    %c0_i32 = arith.constant 0 : i32
    %c0_i32_0 = arith.constant 0 : i32
    return %arg0, %c0_i32 : i32, i32
  }
  func.func @transform_1(%arg0: i32) -> (i32, i32) {
    %c0_i32 = arith.constant 0 : i32
    %c0_i32_0 = arith.constant 0 : i32
    return %arg0, %c0_i32 : i32, i32
  }
  func.func @transform_2(%arg0: i32) -> (i32, i32, i32) {
    %c0_i32 = arith.constant 0 : i32
    %c0_i32_0 = arith.constant 0 : i32
    %c0_i32_1 = arith.constant 0 : i32
    return %arg0, %c0_i32, %c0_i32_0 : i32, i32, i32
  }
}

</mosaic_0001>

<bundles_post_ra>
// kernel: tpu_custom_call.1
= control target key start
LH: loop header
LB: loop body
LE: loop exit
PB: predicated region body
PF: predicated region fallthrough
CT: control target
= control target key end

     0   :  { %7 = vsyncpa [#allocation3], 0  ;;  %s571_s0 = inlined_call_operand.vmem [shape: f32[16,32], index: 0, kind: input, shape index: {}]   ;;  %s572_s1 = inlined_call_operand.vmem [shape: s32[16,1], index: 1, kind: input, shape index: {}]   ;;  %s573_s2 = inlined_call_operand.hbm [shape: f32[2,8,128], index: 2, kind: output, shape index: {}]  }
   0x1   :  { %9 = vsyncpa [#allocation3 + $0x1], 0  ;;  %s459_s9 = smov 0   ;;  %s461_s10 = smov 0  }
   0x2   :  { %s463_s11 = smov 0   ;;  %s465_s12 = smov 0  }
   0x3 LB: > { %s480_s13 = sadd.s32 4294967295, %s439_s12   ;;  %s312_s14 = sadd.s32 4294967294, %s439_s12   ;;  %s439_s12 = sphi %s465_s12, %s579_s12   ;;  %s435_s11 = sphi %s463_s11, %s578_s11   ;;  %s431_s10 = sphi %s461_s10, %s577_s10   ;;  %s427_s9 = sphi %s459_s9, %s576_s9  }
   0x4   : > { %s484_s15 = sadd.s32 1, %s439_s12   ;;  %s74_s16 = sadd.s32 1, %s435_s11 }
   0x5   : > { %s71_s17 = ssub.s32 %s439_s12, %s484_s15  ;;  %p84_p0 = scmp.ne.s32.totalorder %s435_s11, %s431_s10 }
   0x6   : > { %p72_p1 = scmp.eq.s32.totalorder %s71_s17, 0  ;;  %p85_p2 = scmp.eq.s32.totalorder %s480_s13, 1 }
   0x7   : > { %p90_p3 = scmp.ne.s32.totalorder %s431_s10, %s427_s9  ;;  %p91_p4 = scmp.eq.s32.totalorder %s312_s14, 1 }
   0x8   : > { %s495_s18 = scalar_select %p72_p1, %s435_s11, %s74_s16  }
   0x9   : > { %p497_p5 = por %p85_p2, %p84_p0  ;;  %p501_p6 = por %p91_p4, %p90_p3 }
   0xa   : > { %p315_p7 = scmp.ge.s32.totalorder %s439_s12, 1  ;;  %p123_p8 = scmp.lt.s32.totalorder %s439_s12, 3 }
   0xc   : > { %p124_p9 = pnand %p315_p7, %p123_p8 }
   0xd   : > { %p148_p10 = scmp.lt.s32.totalorder (!%p124_p9), %s480_s13, 1  ;;  %v441_v0 = vmov (!%p124_p9), 0   ;;  %vm166_vm0 = vcmask (!%p124_p9), 261120   ;;  %v159_v7 = vlaneseq (!%p124_p9)  ;;  %s319_s29 = sshll.u32 (!%p124_p9), %s480_s13, 3  ;;  %vm197_vm5 = vcmask (!%p124_p9), 7168  }
   0xe   : > { %127 = sbr.rel (%p124_p9) target bundleno = 592 (0x250), region = 28  ;;  %370 = vset.pattern.permute.xlu0 (!%p124_p9), %v441_v0  ;;  %v161_v21 = vstv (!%p124_p9), %s319_s29  ;;  %v442_v30 = vmov (!%p124_p9), 0.0   ;;  %s145_s30 = sand.u32 (!%p124_p9), 1, %s431_s10  }
   0xf   : > { %v516_v8 = vand.u32 (!%p124_p9), 127, %v159_v7  ;;  %v160_v20 = vshrl.u32 (!%p124_p9), %v159_v7, 7  ;;  %s316_s3 = sshll.u32 (!%p124_p9), %s145_s30, 3  ;;  %s322_s4 = sshll.u32 (!%p124_p9), %s480_s13, 7 }
  0x10   : > { %s147_s6 = scalar_lea.vmem (!%p124_p9), [#allocation2], %s316_s3  ;;  %s529_s17 = scalar_lea.hbm (!%p124_p9), %s573_s2, %s322_s4 }
  0x11   : > { %v162_v24 = vadd.s32 (!%p124_p9), %v161_v21, %v160_v20  ;;  %vm221_vm6 = vcmp.eq.s32.totalorder (!%p124_p9), %v516_v8, 1  ;;  %s241_s7 = sshll.u32 (!%p124_p9), %s147_s6, 4  ;;  %vm220_vm7 = vcmp.eq.s32.totalorder (!%p124_p9), %v516_v8, 0  ;;  %s531_s7 = int_to_ptr.vmem [resolvable:$true] %s241_s7 }
  0x13   : > { %vm163_vm3 = vcmp.lt.s32.totalorder (!%p124_p9), %v162_v24, 16 }
  0x15   : > { %s149_s21 = scalar_select %p148_p10, %s480_s13, 1 }
  0x16   : > { %s228_s13 = scalar_lea.sflag [#allocation3], %s145_s30 }
  0x17   : > { %s317_s22 = sshll.u32 %s149_s21, 3  ;;  %s377_s21 = scalar_lea.vmem %s531_s7, 128 }
  0x18   : > { %s151_s25 = scalar_lea.vmem %s571_s0, %s317_s22  ;;  %s155_s28 = scalar_lea.vmem %s572_s1, %s317_s22 }
  0x19   : > { %v156_v1 = vld [vmem:[%s151_s25] sm:$0xff]  ;;  %p378_p11 = scmp.ne.s32.totalorder %s531_s7, %s377_s21  ;;  %s443_s22 = smov [#allocation2]  }
  0x1a   : > { %v167_v2 = vsel %vm166_vm0, %v156_v1, -inf  ;;  %v157_v3 = vld [vmem:[%s155_s28] sm:$0xff]  ;;  %s381_s23 = sshll.u32 %s443_s22, 4  ;;  %s382_s23 = int_to_ptr.vmem [resolvable:$false] %s381_s23 }
  0x1b   : > { %168 = vmax.xlane.f32.xlu0 %v167_v2  ;;  %vm164_vm2 = vcmp.ne.s32.totalorder %v157_v3, 4294967196  ;;  %p379_p12 = pnand %p378_p11, %p497_p5  ;;  %s383_s24 = scalar_lea.vmem %s382_s23, 256 }
  0x1c   : > { %vm165_vm4 = vmand %vm163_vm3, %vm164_vm2  ;;  %p384_p0 = scmp.lt.s32.totalorder %s531_s7, %s382_s23  ;;  %p385_p1 = scmp.lt.s32.totalorder %s383_s24, %s377_s21 }
  0x1d   : > { %v320_v31 = vsel %vm165_vm4, 1.0, %v442_v30  ;;  %p380_p13 = pneg %p379_p12 }
  0x1e   : > { %v210_v33 = vsel %vm197_vm5, %v320_v31, 0.0  ;;  %p386_p2 = por %p385_p1, %p384_p0 }
  0x20   : > { %p387_p3 = pnand %p386_p2, %p380_p13 }
  0x31   : > { %181 = vperm.xlu0 %370, %v157_v3  }
  0xa8   : > { %v169_v4 = vpop.xlane.xlu0 %168 }
  0xa9   : > { %v170_v5 = vsub.f32 %v156_v1, %v169_v4 }
  0xab   : > { %v171_v6 = vmul.f32 1.442695, %v170_v5 }
  0xad   : > { %371 = vpow2.f32 %v171_v6 }
  0xb0   : > { %v182_v9 = vpop.permute.xlu0 %181 }
  0xb1   : > { %vm183_vm1 = vcmp.eq.s32.totalorder %v516_v8, %v182_v9 }
  0xb2   : > { %v184_v12 = vsel %vm183_vm1, %v170_v5, 0.0 }
  0xb3   : > { %v185_v13 = vsel %vm166_vm0, %v184_v12, 0.0 }
  0xb7   : > { %v372_v10 = vpop.eup %371 }
  0xb8   : > { %v173_v11 = vsel %vm166_vm0, %v372_v10, 0.0 }
  0xb9   : > { %174 = vadd.xlane.f32.xlu1 %v173_v11 }
  0xbd   : > { %186 = vadd.xlane.f32.xlu1 %v185_v13 }
 0x146   : > { %v175_v14 = vpop.xlane.xlu1 %174 }
 0x147   : > { %373 = vlog2.f32 %v175_v14 }
 0x14a   : > { %v187_v17 = vpop.xlane.xlu1 %186 }
 0x151   : > { %v374_v15 = vpop.eup %373 }
 0x152   : > { %v177_v16 = vmul.f32 0.6931472, %v374_v15 }
 0x154   : > { %v188_v18 = vsub.f32 %v187_v17, %v177_v16 }
 0x156   : > { %v189_v19 = vmul.f32 1.442695, %v188_v18 }
 0x158   : > { %375 = vpow2.f32 %v189_v19 }
 0x162   : > { %v376_v22 = vpop.eup %375 }
 0x163   : > { %v191_v23 = vsub.f32 1.0, %v376_v22 }
 0x165   : > { %v192_v25 = vmax.f32 %v191_v23, 0.0 }
 0x167   : > { %v193_v26 = vmul.f32 %v192_v25, %v192_v25 }
 0x169   : > { %v194_v27 = vmul.f32 %v193_v26, %v188_v18 }
 0x16b   : > { %v195_v28 = vsub.f32 0.0, %v194_v27 }
 0x16d   : > { %v196_v29 = vsel %vm165_vm4, %v195_v28, 0.0 }
 0x16e   : > { %v198_v32 = vsel %vm197_vm5, %v196_v29, 0.0 }
 0x16f   : > { %199 = vadd.xlane.f32.xlu1 %v198_v32 }
 0x173   : > { %211 = vadd.xlane.f32.xlu1 %v210_v33 }
 0x1fc   : > { %v200_v34 = vpop.xlane.xlu1 %199 }
 0x1fd   : > { %v201_v35 = vrot.slane %v200_v34, 4 }
 0x1ff   : > { %v202_v36 = vadd.f32 %v201_v35, %v200_v34 }
 0x200   : > { %v212_v37 = vpop.xlane.xlu1 %211 }
 0x201   : > { %v203_v38 = vrot.slane %v202_v36, 2  ;;  %v213_v39 = vrot.slane %v212_v37, 4 }
 0x203   : > { %v214_v40 = vadd.f32 %v213_v39, %v212_v37  ;;  %v204_v41 = vadd.f32 %v203_v38, %v202_v36 }
 0x205   : > { %v215_v42 = vrot.slane %v214_v40, 2  ;;  %v205_v43 = vrot.slane %v204_v41, 1 }
 0x207   : > { %v216_v44 = vadd.f32 %v215_v42, %v214_v40  ;;  %v206_v45 = vadd.f32 %v205_v43, %v204_v41 }
 0x209   : > { %325 = vpush %v206_v45  ;;  %v217_v46 = vrot.slane %v216_v44, 1 }
 0x20b   : > { %v218_v47 = vadd.f32 %v217_v46, %v216_v44 }
 0x20d   : > { %327 = vpush %v218_v47 }
 0x23a   : > { %s326_s5 = spop %325 }
 0x23b   : > { %v224_v49 = vstv %s326_s5 }
 0x23e   : > { %s328_s8 = spop %327 }
 0x23f   : > { %v222_v48 = vstv %s328_s8 }
 0x240   : > { %v223_v50 = vsel %vm221_vm6, %v222_v48, 0.0 }
 0x241   : > { %v225_v51 = vsel %vm220_vm7, %v224_v49, %v223_v50 }
 0x242   : > { %226 = vst [vmem:[%s147_s6] sm:$0xff] %v225_v51 }
 0x243   : > { %390 = shalt.err (!%p387_p3)
}
 0x244   : > { %s391_s25 = scalar_lea.hbm %s529_s17, 128  ;;  %s395_s28 = scalar_lea.hbm %s573_s2, 256 }
 0x245   : > { %p392_p4 = scmp.ne.s32.totalorder %s529_s17, %s391_s25  ;;  %p396_p9 = scmp.lt.u32.totalorder %s529_s17, %s573_s2 }
 0x246   : > { %p397_p10 = scmp.lt.u32.totalorder %s395_s28, %s391_s25  ;;  %p399_p12 = scmp.lt.u32.totalorder %s391_s25, %s529_s17 }
 0x247   : > { %p393_p7 = pnand %p392_p4, %p497_p5 }
 0x248   : > { %p398_p11 = por %p397_p10, %p396_p9 }
 0x249   : > { %p394_p8 = pneg %p393_p7 }
 0x24a   : > { %p400_p13 = por %p399_p12, %p398_p11 }
 0x24c   : > { %p401_p0 = pnand %p400_p13, %p394_p8 }
 0x24e   : > { %404 = shalt.err (!%p401_p0)
}
 0x24f   : > { %329 = dma.vmem_to_hbm [thread:$0]  (%p497_p5), %s531_s7, 128, %s529_s17, %s228_s13  }
 0x250 PF: > { %p335_p1 = scmp.ge.s32.totalorder %s439_s12, 2  ;;  %s253_s3 = sand.u32 1, %s427_s9  }
 0x251   : > { %s254_s4 = scalar_lea.sflag [#allocation3], %s253_s3 }
 0x252   : > { %p332_p2 = pnand %p335_p1, %p501_p6 }
 0x254   : > { %422 = dma.done.wait (!%p332_p2), %s254_s4, 128  }
 0x255   : > { %424 = vsyncadd (!%p332_p2), %s254_s4, 4294967168  ;;  %p12_p3 = scmp.ge.s32.totalorder %s484_s15, 4   ;;  %s576_s9 = smov %s431_s10 }
 0x256   : > { %s577_s10 = smov %s435_s11  ;;  %s578_s11 = smov %s495_s18 }
 0x257   : > { %s579_s12 = smov %s484_s15  ;;  %14 = sbr.rel (!%p12_p3) target bundleno = 3 (0x3), region = 66 }
 0x25e   :  { %259 = vsyncpa [#allocation3], 1 }
 0x25f   :  { %261 = vsyncpa [#allocation3 + $0x1], 1 }

</bundles_post_ra>
